<compile_context>
chip_gen: v7x
topology: tpu7x:2x2x1
jax: 0.10.0
libtpu: 0.0.40
codegen_flags: <defaults>
</compile_context>

<pallas_src>
import math

import jax
import jax.numpy as jnp
import numpy as np
from jax.experimental import pallas as pl
from jax.experimental.pallas import tpu as pltpu


def _kernel(x_ref, wxh_ref, w1t_ref, wq_ref, bs_ref, w2_ref, b2_ref, out_ref):
    # x_ref:   (B_blk, N, in_d)   block of batch elements
    # wxh_ref: (in_d, out_d)      fused weight  w1^T @ w_h   (module needs in_d == out_d)
    # w1t_ref: (in_d, out_d)      fc1 weight, pre-transposed
    # wq_ref:  (in_d, out_d)      w_q
    # bs_ref:  (1, out_d)         bs
    # w2_ref:  (1, out_d)         fc2 weight (row)
    # b2_ref:  (1, 1)             fc2 bias
    # out_ref: (B_blk, N)         softmax attention weights, lane-dense
    b_blk, n, in_d = x_ref.shape
    out_d = wxh_ref.shape[1]

    x3 = x_ref[...]
    x2 = x3.reshape(b_blk * n, in_d)            # leading-dim merge (N multiple of 8)

    # x1 @ w_h  ==  x @ (w1^T @ w_h): the only M = B_blk*N sized matmul.
    xh = jnp.dot(x2, wxh_ref[...], preferred_element_type=jnp.float32)      # (M, out_d)

    # q = relu(mean_N(fc1(x))) = relu(mean_N(x) @ w1^T)   (mean is linear)
    mean_x = jnp.mean(x3, axis=1)                                           # (B_blk, in_d)
    q = jnp.maximum(
        jnp.dot(mean_x, w1t_ref[...], preferred_element_type=jnp.float32),
        0.0)                                                                # (B_blk, out_d)
    qw = jnp.dot(q.astype(wq_ref.dtype), wq_ref[...],
                 preferred_element_type=jnp.float32)                        # (B_blk, out_d)

    # h = x1 @ w_h + (q @ w_q)[:, None, :] + bs ; tanh   (f32 accumulation)
    h = xh.reshape(b_blk, n, out_d) + qw[:, None, :] + bs_ref[...]
    h = jnp.tanh(h)

    # fc2 score, contracting out_d (the lane axis) -> lane-dense (B_blk, N).
    s = jnp.sum(h * w2_ref[...], axis=-1) + b2_ref[...]                     # (B_blk, N)

    # softmax over the sequence axis (now the lane axis).
    s_max = jnp.max(s, axis=-1, keepdims=True)
    e = jnp.exp(s - s_max)
    denom = jnp.sum(e, axis=-1, keepdims=True)
    inv = pl.reciprocal(denom, approx=True)          # EUP seed (free slot)
    inv = inv * (2.0 - denom * inv)                  # one Newton step -> ~f32 accuracy
    out_ref[...] = e * inv


def _choose_b_blk(B, N):
    # Aim for ~512 rows (B_blk*N) per grid step so the MXU M dimension is well
    # filled.  When several grid steps are needed, the batch block is the
    # second-minor dim of the 2-D output block, so keep it a multiple of 8.
    b_blk = max(1, pl.cdiv(512, N))
    if b_blk >= B:
        return B                      # whole batch in one step (full-dim block)
    return max(8, ((b_blk + 7) // 8) * 8)


def kernel_attention_sigmoid(x, w1, w_h, w_q, bs, w2, b2,
                             *, b_blk=None, matmul_dtype=jnp.float32):
    B, N, in_d = x.shape
    out_d = w1.shape[0]

    if b_blk is None:
        b_blk = _choose_b_blk(B, N)
    grid_b = pl.cdiv(B, b_blk)
    b_pad = grid_b * b_blk
    if b_pad != B:
        # Zero-pad the batch so every grid step sees a full block; padded rows
        # are computed independently (per-batch mean/softmax) and sliced off.
        x = jnp.pad(x, ((0, b_pad - B), (0, 0), (0, 0)))

    # Weight-space pre-computation in XLA (tiny, once per call):
    #   w1t  = w1^T             feeds the MXU with contraction on the lane axis
    #   w_xh = w1^T @ w_h       fuses fc1 into the w_h matmul (x1 @ w_h == x @ w_xh)
    w1t = jnp.transpose(w1).astype(jnp.float32)          # (in_d, out_d)
    w_xh = jnp.dot(w1t, w_h.astype(jnp.float32))         # (in_d, out_d)

    x = x.astype(matmul_dtype)
    w1t = w1t.astype(matmul_dtype)
    w_xh = w_xh.astype(matmul_dtype)
    w_q = w_q.astype(matmul_dtype)
    bs2 = bs.reshape(1, out_d).astype(jnp.float32)
    w2r = w2.reshape(1, out_d).astype(jnp.float32)
    b22 = b2.reshape(1, 1).astype(jnp.float32)

    def full(shape):
        return pl.BlockSpec(shape, lambda b: (0,) * len(shape))

    out = pl.pallas_call(
        _kernel,
        out_shape=jax.ShapeDtypeStruct((b_pad, N), jnp.float32),
        grid_spec=pltpu.PrefetchScalarGridSpec(
            num_scalar_prefetch=0,
            grid=(grid_b,),
            in_specs=[
                pl.BlockSpec((b_blk, N, in_d), lambda b: (b, 0, 0)),
                full((in_d, out_d)),     # w_xh (fused fc1 @ w_h)
                full((in_d, out_d)),     # w1^T
                full((in_d, out_d)),     # w_q
                full((1, out_d)),        # bs
                full((1, out_d)),        # fc2 weight
                full((1, 1)),            # fc2 bias
            ],
            out_specs=pl.BlockSpec((b_blk, N), lambda b: (b, 0)),
        ),
        compiler_params=pltpu.CompilerParams(
            dimension_semantics=("parallel",),     # batch-block axis: megacore-shardable
            vmem_limit_bytes=32 * 1024 * 1024,     # explicit, safe on v5e/v6e/v7x
        ),
    )(x, w_xh, w1t, w_q, bs2, w2r, b22)

    # Restore the PyTorch output shape (B, N, 1).
    return out[:B, :, None]


def _reference(x, w1, w_h, w_q, bs, w2, b2):
    x1 = jnp.einsum("bnd,od->bno", x, w1)
    q = jax.nn.relu(jnp.mean(x1, axis=1))
    h = (jnp.einsum("bno,ok->bnk", x1, w_h)
         + jnp.einsum("bo,ok->bk", q, w_q)[:, None, :] + bs)
    h = jnp.tanh(h)
    s = jnp.einsum("bnk,ok->bno", h, w2) + b2
    return jax.nn.softmax(s, axis=1)


if __name__ == "__main__":
    # module implicitly requires in_d == out_d (x1 @ w_h after fc1)
    B, N, in_d, out_d = 4, 8, 32, 32

    key = jax.random.PRNGKey(0)
    k_x, k_w1, k_wh, k_wq, k_bs, k_w2, k_b2 = jax.random.split(key, 7)
    x = jax.random.normal(k_x, (B, N, in_d), jnp.float32)

    # deterministic xavier-normal style init (std = sqrt(2/(fan_in+fan_out)))
    def xavier(k, shape):
        fan_out, fan_in = shape[0], shape[1]
        std = math.sqrt(2.0 / (fan_in + fan_out))
        return std * jax.random.normal(k, shape, jnp.float32)

    w1 = xavier(k_w1, (out_d, in_d))                     # fc1.weight
    w_h = xavier(k_wh, (in_d, out_d))
    w_q = xavier(k_wq, (in_d, out_d))
    bound = 1.0 / math.sqrt(out_d)
    bs = jax.random.uniform(k_bs, (out_d,), jnp.float32, -bound, bound)
    w2 = xavier(k_w2, (1, out_d))                        # fc2.weight
    b2 = jax.random.uniform(k_b2, (1,), jnp.float32, -bound, bound)

    ref = _reference(x, w1, w_h, w_q, bs, w2, b2)

    # Default path: whole (small) batch handled in a single grid step.
    out = jax.block_until_ready(kernel_attention_sigmoid(x, w1, w_h, w_q, bs, w2, b2))
    assert out.shape == (B, N, 1)
    assert np.allclose(np.asarray(out), np.asarray(ref), atol=1e-4, rtol=1e-4)

    # Multi-grid-step path with batch padding (b_blk < B, B not divisible).
    x2 = jnp.tile(x, (3, 1, 1))                          # B = 12
    ref2 = _reference(x2, w1, w_h, w_q, bs, w2, b2)
    out2 = jax.block_until_ready(
        kernel_attention_sigmoid(x2, w1, w_h, w_q, bs, w2, b2, b_blk=8))
    assert out2.shape == (12, N, 1)
    assert np.allclose(np.asarray(out2), np.asarray(ref2), atol=1e-4, rtol=1e-4)

    print("KERNEL_OK")
</pallas_src>

<mosaic_0001>
module attributes {stable_mosaic.version = 11 : i64} {
  func.func @_kernel(%arg0: i32, %arg1: memref<4x8x32xf32, #tpu.memory_space<vmem>>, %arg2: memref<32x32xf32, #tpu.memory_space<vmem>>, %arg3: memref<32x32xf32, #tpu.memory_space<vmem>>, %arg4: memref<32x32xf32, #tpu.memory_space<vmem>>, %arg5: memref<1x32xf32, #tpu.memory_space<vmem>>, %arg6: memref<1x32xf32, #tpu.memory_space<vmem>>, %arg7: memref<1x1xf32, #tpu.memory_space<vmem>>, %arg8: memref<4x8xf32, #tpu.memory_space<vmem>>) attributes {dimension_semantics = [#tpu.dimension_semantics<parallel>], iteration_bounds = array<i64: 1>, scalar_prefetch = 0 : i64, scratch_operands = 0 : i64, tpu.core_type = #tpu.core_type<tc>, window_params = [{transform_indices = @transform_0, window_bounds = array<i64: 4, 8, 32>}, {pipeline_mode = #tpu.pipeline_mode<synchronous>, transform_indices = @transform_1, window_bounds = array<i64: 32, 32>}, {pipeline_mode = #tpu.pipeline_mode<synchronous>, transform_indices = @transform_2, window_bounds = array<i64: 32, 32>}, {pipeline_mode = #tpu.pipeline_mode<synchronous>, transform_indices = @transform_3, window_bounds = array<i64: 32, 32>}, {pipeline_mode = #tpu.pipeline_mode<synchronous>, transform_indices = @transform_4, window_bounds = array<i64: 1, 32>}, {pipeline_mode = #tpu.pipeline_mode<synchronous>, transform_indices = @transform_5, window_bounds = array<i64: 1, 32>}, {pipeline_mode = #tpu.pipeline_mode<synchronous>, transform_indices = @transform_6, window_bounds = array<i64: 1, 1>}, {transform_indices = @transform_7, window_bounds = array<i64: 4, 8>}]} {
    %c0 = arith.constant 0 : index
    %c0_0 = arith.constant 0 : index
    %c0_1 = arith.constant 0 : index
    %0 = vector.load %arg1[%c0, %c0_0, %c0_1] : memref<4x8x32xf32, #tpu.memory_space<vmem>>, vector<4x8x32xf32>
    %1 = vector.shape_cast %0 : vector<4x8x32xf32> to vector<32x32xf32>
    %c0_2 = arith.constant 0 : index
    %c0_3 = arith.constant 0 : index
    %2 = vector.load %arg2[%c0_2, %c0_3] : memref<32x32xf32, #tpu.memory_space<vmem>>, vector<32x32xf32>
    %cst = arith.constant dense<0.000000e+00> : vector<32x32xf32>
    %3 = tpu.matmul %1, %2, %cst {dimension_numbers = #tpu.dot_dimension_numbers<[1], [0], [0], [1], [0, 0, 1, 1], [], []>} : vector<32x32xf32>, vector<32x32xf32>, vector<32x32xf32> -> vector<32x32xf32>
    %cst_4 = arith.constant dense<0.000000e+00> : vector<4x32xf32>
    %4 = vector.multi_reduction <add>, %0, %cst_4 [1] : vector<4x8x32xf32> to vector<4x32xf32>
    %cst_5 = arith.constant 8.000000e+00 : f32
    %5 = vector.broadcast %cst_5 : f32 to vector<4x32xf32>
    %6 = arith.divf %4, %5 : vector<4x32xf32>
    %c0_6 = arith.constant 0 : index
    %c0_7 = arith.constant 0 : index
    %7 = vector.load %arg3[%c0_6, %c0_7] : memref<32x32xf32, #tpu.memory_space<vmem>>, vector<32x32xf32>
    %cst_8 = arith.constant dense<0.000000e+00> : vector<4x32xf32>
    %8 = tpu.matmul %6, %7, %cst_8 {dimension_numbers = #tpu.dot_dimension_numbers<[1], [0], [0], [1], [0, 0, 1, 1], [], []>} : vector<4x32xf32>, vector<32x32xf32>, vector<4x32xf32> -> vector<4x32xf32>
    %cst_9 = arith.constant 0.000000e+00 : f32
    %9 = vector.broadcast %cst_9 : f32 to vector<4x32xf32>
    %10 = arith.maximumf %8, %9 : vector<4x32xf32>
    %c0_10 = arith.constant 0 : index
    %c0_11 = arith.constant 0 : index
    %11 = vector.load %arg4[%c0_10, %c0_11] : memref<32x32xf32, #tpu.memory_space<vmem>>, vector<32x32xf32>
    %cst_12 = arith.constant dense<0.000000e+00> : vector<4x32xf32>
    %12 = tpu.matmul %10, %11, %cst_12 {dimension_numbers = #tpu.dot_dimension_numbers<[1], [0], [0], [1], [0, 0, 1, 1], [], []>} : vector<4x32xf32>, vector<32x32xf32>, vector<4x32xf32> -> vector<4x32xf32>
    %13 = vector.shape_cast %3 : vector<32x32xf32> to vector<4x8x32xf32>
    %14 = vector.shape_cast %12 : vector<4x32xf32> to vector<4x1x32xf32>
    %15 = vector.broadcast %14 : vector<4x1x32xf32> to vector<4x8x32xf32>
    %16 = arith.addf %13, %15 : vector<4x8x32xf32>
    %c0_13 = arith.constant 0 : index
    %c0_14 = arith.constant 0 : index
    %17 = vector.load %arg5[%c0_13, %c0_14] : memref<1x32xf32, #tpu.memory_space<vmem>>, vector<1x32xf32>
    %18 = vector.shape_cast %17 : vector<1x32xf32> to vector<1x1x32xf32>
    %19 = vector.broadcast %18 : vector<1x1x32xf32> to vector<4x8x32xf32>
    %20 = arith.addf %16, %19 : vector<4x8x32xf32>
    %21 = math.tanh %20 : vector<4x8x32xf32>
    %c0_15 = arith.constant 0 : index
    %c0_16 = arith.constant 0 : index
    %22 = vector.load %arg6[%c0_15, %c0_16] : memref<1x32xf32, #tpu.memory_space<vmem>>, vector<1x32xf32>
    %23 = vector.shape_cast %22 : vector<1x32xf32> to vector<1x1x32xf32>
    %24 = vector.broadcast %23 : vector<1x1x32xf32> to vector<4x8x32xf32>
    %25 = arith.mulf %21, %24 : vector<4x8x32xf32>
    %cst_17 = arith.constant dense<0.000000e+00> : vector<4x8xf32>
    %26 = vector.multi_reduction <add>, %25, %cst_17 [2] : vector<4x8x32xf32> to vector<4x8xf32>
    %c0_18 = arith.constant 0 : index
    %c0_19 = arith.constant 0 : index
    %27 = vector.load %arg7[%c0_18, %c0_19] : memref<1x1xf32, #tpu.memory_space<vmem>>, vector<1x1xf32>
    %28 = vector.broadcast %27 : vector<1x1xf32> to vector<4x8xf32>
    %29 = arith.addf %26, %28 : vector<4x8xf32>
    %cst_20 = arith.constant dense<0xFF800000> : vector<4xf32>
    %30 = vector.multi_reduction <maximumf>, %29, %cst_20 [1] : vector<4x8xf32> to vector<4xf32>
    %31 = vector.shape_cast %30 : vector<4xf32> to vector<4x1xf32>
    %32 = vector.broadcast %31 : vector<4x1xf32> to vector<4x8xf32>
    %33 = arith.subf %29, %32 : vector<4x8xf32>
    %34 = math.exp %33 : vector<4x8xf32>
    %cst_21 = arith.constant dense<0.000000e+00> : vector<4xf32>
    %35 = vector.multi_reduction <add>, %34, %cst_21 [1] : vector<4x8xf32> to vector<4xf32>
    %36 = vector.shape_cast %35 : vector<4xf32> to vector<4x1xf32>
    %37 = tpu.reciprocal %36 {approx = true} : vector<4x1xf32> -> vector<4x1xf32>
    %38 = arith.mulf %36, %37 : vector<4x1xf32>
    %cst_22 = arith.constant 2.000000e+00 : f32
    %39 = vector.broadcast %cst_22 : f32 to vector<4x1xf32>
    %40 = arith.subf %39, %38 : vector<4x1xf32>
    %41 = arith.mulf %37, %40 : vector<4x1xf32>
    %42 = vector.broadcast %41 : vector<4x1xf32> to vector<4x8xf32>
    %43 = arith.mulf %34, %42 : vector<4x8xf32>
    %c0_23 = arith.constant 0 : index
    %c0_24 = arith.constant 0 : index
    %44 = vector.load %arg8[%c0_23, %c0_24] : memref<4x8xf32, #tpu.memory_space<vmem>>, vector<4x8xf32>
    tpu.vector_store %arg8[%c0_23, %c0_24], %43 {strides = array<i32>} : memref<4x8xf32, #tpu.memory_space<vmem>>, vector<4x8xf32>,
    return
  }
  func.func @transform_0(%arg0: i32) -> (i32, i32, i32) {
    %c0_i32 = arith.constant 0 : i32
    %c0_i32_0 = arith.constant 0 : i32
    %c0_i32_1 = arith.constant 0 : i32
    return %arg0, %c0_i32, %c0_i32_0 : i32, i32, i32
  }
  func.func @transform_1(%arg0: i32) -> (i32, i32) {
    %c0_i32 = arith.constant 0 : i32
    %c0_i32_0 = arith.constant 0 : i32
    %c0_i32_1 = arith.constant 0 : i32
    return %c0_i32, %c0_i32_0 : i32, i32
  }
  func.func @transform_2(%arg0: i32) -> (i32, i32) {
    %c0_i32 = arith.constant 0 : i32
    %c0_i32_0 = arith.constant 0 : i32
    %c0_i32_1 = arith.constant 0 : i32
    return %c0_i32, %c0_i32_0 : i32, i32
  }
  func.func @transform_3(%arg0: i32) -> (i32, i32) {
    %c0_i32 = arith.constant 0 : i32
    %c0_i32_0 = arith.constant 0 : i32
    %c0_i32_1 = arith.constant 0 : i32
    return %c0_i32, %c0_i32_0 : i32, i32
  }
  func.func @transform_4(%arg0: i32) -> (i32, i32) {
    %c0_i32 = arith.constant 0 : i32
    %c0_i32_0 = arith.constant 0 : i32
    %c0_i32_1 = arith.constant 0 : i32
    return %c0_i32, %c0_i32_0 : i32, i32
  }
  func.func @transform_5(%arg0: i32) -> (i32, i32) {
    %c0_i32 = arith.constant 0 : i32
    %c0_i32_0 = arith.constant 0 : i32
    %c0_i32_1 = arith.constant 0 : i32
    return %c0_i32, %c0_i32_0 : i32, i32
  }
  func.func @transform_6(%arg0: i32) -> (i32, i32) {
    %c0_i32 = arith.constant 0 : i32
    %c0_i32_0 = arith.constant 0 : i32
    %c0_i32_1 = arith.constant 0 : i32
    return %c0_i32, %c0_i32_0 : i32, i32
  }
  func.func @transform_7(%arg0: i32) -> (i32, i32) {
    %c0_i32 = arith.constant 0 : i32
    %c0_i32_0 = arith.constant 0 : i32
    return %arg0, %c0_i32 : i32, i32
  }
}

</mosaic_0001>

<bundles_post_ra>
// kernel: tpu_custom_call.1
= control target key start
LH: loop header
LB: loop body
LE: loop exit
PB: predicated region body
PF: predicated region fallthrough
CT: control target
= control target key end

     0   :  { %s1124_s0 = inlined_call_operand.hbm [shape: f32[4,8,32], index: 0, kind: input, shape index: {}]   ;;  %s1125_s1 = inlined_call_operand.hbm [shape: f32[32,32], index: 1, kind: input, shape index: {}]   ;;  %s1126_s2 = inlined_call_operand.hbm [shape: f32[32,32], index: 2, kind: input, shape index: {}]   ;;  %s1127_s3 = inlined_call_operand.hbm [shape: f32[32,32], index: 3, kind: input, shape index: {}]   ;;  %s1128_s4 = inlined_call_operand.vmem [shape: f32[1,32], index: 4, kind: input, shape index: {}]   ;;  %s1129_s5 = inlined_call_operand.vmem [shape: f32[1,32], index: 5, kind: input, shape index: {}]   ;;  %s1130_s6 = inlined_call_operand.<no memory space> [shape: f32[1,1], index: 6, kind: input, shape index: {}]   ;;  %s1131_s7 = inlined_call_operand.hbm [shape: f32[4,8], index: 7, kind: output, shape index: {}]  }
   0x1   :  { %v12_v0 = vstv %s1130_s6 }
   0x2   :  { %13 = vst [vmem:[#allocation2] sm:$0x1] %v12_v0 }
   0x3   :  { %14 = vsyncpa [#allocation4], 0 }
   0x4   :  { %15 = vsyncpa [#allocation7], 0 }
   0x5   :  { %16 = vsyncpa [#allocation10], 0 }
   0x6   :  { %17 = vsyncpa [#allocation5], 0  ;;  %s906_s26 = smov [#allocation6]   ;;  %s907_s28 = smov [#allocation3]  }
   0x7   :  { %s35_s27 = sshll.u32 %s906_s26, 4  ;;  %s23_s29 = sshll.u32 %s907_s28, 4  ;;  %s36_s27 = int_to_ptr.vmem [resolvable:$true] %s35_s27  ;;  %s961_s29 = int_to_ptr.vmem [resolvable:$true] %s23_s29 }
   0x8   :  { %s788_s9 = scalar_lea.hbm %s1125_s1, 512 }
   0x9   :  { %p789_p0 = scmp.ne.s32.totalorder %s1125_s1, %s788_s9  ;;  %p792_p1 = scmp.lt.u32.totalorder %s788_s9, %s1125_s1 }
   0xb   :  { %p794_p2 = pnand %p792_p1, %p789_p0 }
   0xd   :  { %797 = shalt.err (!%p794_p2)
}
   0xe   :  { %s798_s13 = scalar_lea.vmem %s36_s27, 512  ;;  %p803_p4 = scmp.lt.s32.totalorder %s36_s27, %s36_s27 }
   0xf   :  { %p799_p3 = scmp.ne.s32.totalorder %s36_s27, %s798_s13  ;;  %p804_p5 = scmp.lt.s32.totalorder %s798_s13, %s798_s13 }
  0x11   :  { %p805_p6 = por %p804_p5, %p803_p4 }
  0x13   :  { %p806_p7 = pnand %p805_p6, %p799_p3 }
  0x15   :  { %809 = shalt.err (!%p806_p7)
}
  0x16   :  { %s908_s14 = smov 128   ;;  %s909_s15 = smov 8  }
  0x17   :  { %41 = dma.hbm_to_vmem [thread:$0]  %s1125_s1, 512, %s36_s27, [#allocation7], %s908_s14, %s908_s14, %s909_s15  }
  0x18   :  { %s810_s20 = scalar_lea.hbm %s1124_s0, 512 }
  0x19   :  { %p811_p8 = scmp.ne.s32.totalorder %s1124_s0, %s810_s20  ;;  %p814_p9 = scmp.lt.u32.totalorder %s810_s20, %s1124_s0 }
  0x1b   :  { %p816_p10 = pnand %p814_p9, %p811_p8 }
  0x1d   :  { %819 = shalt.err (!%p816_p10)
}
  0x1e   :  { %s820_s25 = scalar_lea.vmem %s961_s29, 512  ;;  %p825_p12 = scmp.lt.s32.totalorder %s961_s29, %s961_s29 }
  0x1f   :  { %p821_p11 = scmp.ne.s32.totalorder %s961_s29, %s820_s25  ;;  %p826_p13 = scmp.lt.s32.totalorder %s820_s25, %s820_s25 }
  0x21   :  { %p827_p0 = por %p826_p13, %p825_p12 }
  0x23   :  { %p828_p1 = pnand %p827_p0, %p821_p11 }
  0x25   :  { %831 = shalt.err (!%p828_p1)
}
  0x26   :  { %29 = dma.hbm_to_vmem [thread:$0]  %s1124_s0, 512, %s961_s29, [#allocation4], %s908_s14, %s908_s14, %s909_s15  }
  0x27   :  { %s910_s27 = smov [#allocation8]   ;;  %s911_s30 = smov [#allocation9]  }
  0x28   :  { %s47_s28 = sshll.u32 %s910_s27, 4  ;;  %s59_s8 = sshll.u32 %s911_s30, 4  ;;  %s48_s28 = int_to_ptr.vmem [resolvable:$true] %s47_s28  ;;  %s998_s8 = int_to_ptr.vmem [resolvable:$true] %s59_s8 }
  0x29   :  { %s832_s11 = scalar_lea.hbm %s1126_s2, 512 }
  0x2a   :  { %p833_p2 = scmp.ne.s32.totalorder %s1126_s2, %s832_s11  ;;  %p836_p3 = scmp.lt.u32.totalorder %s832_s11, %s1126_s2 }
  0x2c   :  { %p838_p4 = pnand %p836_p3, %p833_p2 }
  0x2e   :  { %841 = shalt.err (!%p838_p4)
}
  0x2f   :  { %s842_s0 = scalar_lea.vmem %s48_s28, 512  ;;  %p847_p6 = scmp.lt.s32.totalorder %s48_s28, %s48_s28 }
  0x30   :  { %p843_p5 = scmp.ne.s32.totalorder %s48_s28, %s842_s0  ;;  %p848_p7 = scmp.lt.s32.totalorder %s842_s0, %s842_s0 }
  0x32   :  { %p849_p8 = por %p848_p7, %p847_p6 }
  0x34   :  { %p850_p9 = pnand %p849_p8, %p843_p5 }
  0x36   :  { %853 = shalt.err (!%p850_p9)
}
  0x37   :  { %53 = dma.hbm_to_vmem [thread:$0]  %s1126_s2, 512, %s48_s28, [#allocation7], %s908_s14, %s908_s14, %s909_s15  }
  0x38   :  { %s854_s20 = scalar_lea.hbm %s1127_s3, 512 }
  0x39   :  { %p855_p10 = scmp.ne.s32.totalorder %s1127_s3, %s854_s20  ;;  %p858_p11 = scmp.lt.u32.totalorder %s854_s20, %s1127_s3 }
  0x3b   :  { %p860_p12 = pnand %p858_p11, %p855_p10 }
  0x3d   :  { %863 = shalt.err (!%p860_p12)
}
  0x3e   :  { %s864_s25 = scalar_lea.vmem %s998_s8, 512  ;;  %p869_p0 = scmp.lt.s32.totalorder %s998_s8, %s998_s8 }
  0x3f   :  { %p865_p13 = scmp.ne.s32.totalorder %s998_s8, %s864_s25  ;;  %p870_p1 = scmp.lt.s32.totalorder %s864_s25, %s864_s25 }
  0x41   :  { %p871_p2 = por %p870_p1, %p869_p0 }
  0x43   :  { %p872_p3 = pnand %p871_p2, %p865_p13 }
  0x45   :  { %875 = shalt.err (!%p872_p3)
}
  0x46   :  { %65 = dma.hbm_to_vmem [thread:$0]  %s1127_s3, 512, %s998_s8, [#allocation10], %s908_s14, %s908_s14, %s909_s15  }
  0x47   :  { %898 = dma.done.wait [#allocation4], 512  }
  0x48   :  { %899 = vsyncadd [#allocation4], 4294966784 }
  0x49   :  { %900 = dma.done.wait [#allocation7], 1024  }
  0x4a   :  { %901 = vsyncadd [#allocation7], 4294966272 }
  0x4b   :  { %902 = dma.done.wait [#allocation10], 512  }
  0x4c   :  { %903 = vsyncadd [#allocation10], 4294966784  ;;  %v912_v1 = vmov 0.0|0.0   ;;  %vm913_vm0 = vmmov 0   ;;  %v914_v2 = vmov 0.0   ;;  %vm92_vm1 = vcmask 261120  }
  0x4d   :  { %744 = vmatprep.subr.bf16.mxu1 %v912_v1  ;;  %722 = vmatprep.mubr.msk.f32.mxu1 %vm913_vm0, %v914_v2  ;;  %v223_v3 = vld [vmem:[#allocation8] sm:$0xff]  ;;  %v224_v4 = vld [vmem:[#allocation8 + $0x8] sm:$0xff]  ;;  %v225_v5 = vld [vmem:[#allocation8 + $0x10] sm:$0xff]  ;;  %vm231_vm2 = vcmask 1041409   ;;  %vm233_vm3 = vcmask 1042434   ;;  %vm235_vm4 = vcmask 1043459  }
  0x4e   :  { %v745_v6 = vpack.c.bf16 %v224_v4, %v223_v3  ;;  %v226_v7 = vld [vmem:[#allocation8 + $0x18] sm:$0xff]  ;;  %v84_v8 = vld [vmem:[#allocation3] sm:$0xff]  ;;  %v85_v9 = vld [vmem:[#allocation3 + $0x8] sm:$0xff]  ;;  %v915_v4 = vmov 0   ;;  %vm514_vm5 = vcmask 60416  }
  0x4f   :  { %v748_v10 = vpack.c.bf16 %v226_v7, %v225_v5  ;;  %v86_v11 = vld [vmem:[#allocation3 + $0x10] sm:$0xff]  ;;  %v1038_v12 = vld [vmem:[#allocation3 + $0x18] sm:$0xff]  ;;  %v190_v13 = vsel %vm92_vm1, %v84_v8, 0.0  ;;  %v197_v14 = vsel %vm92_vm1, %v85_v9, 0.0  ;;  %v88_v15 = vld [vmem:[#allocation6] sm:$0xff]  ;;  %708 = vmatprep.mubr.msk.f32.mxu0 %vm92_vm1, %v84_v8  ;;  %768 = vset.pattern.permute.xlu0 %v915_v4  ;;  %v391_v7 = vlaneseq }
  0x50   :  { %746 = vmatpush3.bf16.msra.mxu1 %v745_v6  ;;  %v191_v16 = vrot.slane %v190_v13, 4  ;;  %v198_v17 = vrot.slane %v197_v14, 4  ;;  %v204_v18 = vsel %vm92_vm1, %v86_v11, 0.0  ;;  %v211_v19 = vsel %vm92_vm1, %v1038_v12, 0.0  ;;  %v89_v20 = vld [vmem:[#allocation6 + $0x8] sm:$0xff]  ;;  %v90_v21 = vld [vmem:[#allocation6 + $0x10] sm:$0xff]  ;;  %769 = vset.pattern.permute.xlu1 %v915_v4 }
  0x51   :  { %747 = vmatprep.subr.bf16.mxu1 %v912_v1  ;;  %v205_v22 = vrot.slane %v204_v18, 4  ;;  %v212_v23 = vrot.slane %v211_v19, 4  ;;  %v736_v24 = vpack.c.bf16 %v89_v20, %v88_v15  ;;  %v91_v25 = vld [vmem:[#allocation6 + $0x18] sm:$0xff]  ;;  %v310_v35 = vld [vmem:[#allocation9] sm:$0xff]  ;;  %v311_v36 = vld [vmem:[#allocation9 + $0x8] sm:$0xff] }
  0x52   :  { %v192_v26 = vadd.f32 %v191_v16, %v190_v13  ;;  %v199_v27 = vadd.f32 %v198_v17, %v197_v14  ;;  %v740_v28 = vpack.c.bf16 %v91_v25, %v90_v21  ;;  %v751_v43 = vpack.c.bf16 %v311_v36, %v310_v35  ;;  %v312_v46 = vld [vmem:[#allocation9 + $0x10] sm:$0xff]  ;;  %v313_v47 = vld [vmem:[#allocation9 + $0x18] sm:$0xff] }
  0x53   :  { %v206_v29 = vadd.f32 %v205_v22, %v204_v18  ;;  %v213_v30 = vadd.f32 %v212_v23, %v211_v19  ;;  %737 = vmatprep.subr.bf16.mxu0 %v736_v24  ;;  %v754_v54 = vpack.c.bf16 %v313_v47, %v312_v46  ;;  %v916_v5 = vmov 1966171168   ;;  %v679_v19 = vld [vmem:[%s1128_s4] ss:$0 sm:$0xff] }
  0x54   :  { %749 = vmatpush3.bf16.msra.mxu1 %v748_v10  ;;  %v193_v31 = vrot.slane %v192_v26, 2  ;;  %v200_v32 = vrot.slane %v199_v27, 2  ;;  %739 = vmatpush3.bf16.msra.mxu0 %v736_v24  ;;  %v389_v6 = vunpack.c.l.s4 %v916_v5 }
  0x55   :  { %v207_v33 = vrot.slane %v206_v29, 2  ;;  %v214_v34 = vrot.slane %v213_v30, 2  ;;  %741 = vmatprep.subr.bf16.mxu0 %v740_v28 }
  0x56   :  { %v194_v37 = vadd.f32 %v193_v31, %v192_v26  ;;  %v201_v38 = vadd.f32 %v200_v32, %v199_v27  ;;  %v390_v8 = vunpack.c.0.s8 %v389_v6  ;;  %v680_v32 = vld [vmem:[%s1129_s5] ss:$0 sm:$0xff]  ;;  %s917_s5 = smov [#allocation11]  }
  0x57   :  { %v208_v39 = vadd.f32 %v207_v33, %v206_v29  ;;  %v215_v40 = vadd.f32 %v214_v34, %v213_v30  ;;  %s662_s26 = sshll.u32 %s917_s5, 4  ;;  %s663_s26 = int_to_ptr.vmem [resolvable:$true] %s662_s26 }
  0x58   :  { %v195_v41 = vrot.slane %v194_v37, 1  ;;  %v202_v42 = vrot.slane %v201_v38, 1  ;;  %743 = vmatpush3.bf16.msra.mxu0 %v740_v28  ;;  %s876_s27 = scalar_lea.vmem %s663_s26, 64  ;;  %p881_p5 = scmp.lt.s32.totalorder %s663_s26, %s663_s26 }
  0x59   :  { %v209_v44 = vrot.slane %v208_v39, 1  ;;  %v216_v45 = vrot.slane %v215_v40, 1  ;;  %750 = vmatprep.subr.bf16.mxu0 %v912_v1  ;;  %p877_p4 = scmp.ne.s32.totalorder %s663_s26, %s876_s27  ;;  %p882_p6 = scmp.lt.s32.totalorder %s876_s27, %s876_s27 }
  0x5a   :  { %v196_v48 = vadd.f32 %v195_v41, %v194_v37  ;;  %v203_v49 = vadd.f32 %v202_v42, %v201_v38 }
  0x5b   :  { %v210_v50 = vadd.f32 %v209_v44, %v208_v39  ;;  %v217_v51 = vadd.f32 %v216_v45, %v215_v40  ;;  %709 = vmatmul.mubr.msk.f32.vlgmr.msra.gmra.mrb[0].mxu0 %vm92_vm1, %v85_v9  ;;  %v1060_v9 = vshrl.u32 %v391_v7, 7  ;;  %v681_v45 = vld [vmem:[#allocation2] ss:$0 sm:$0xff]  ;;  %p883_p7 = por %p882_p6, %p881_p5 }
  0x5c   :  { %v219_v52 = vmul.f32 0.125, %v196_v48  ;;  %v220_v53 = vmul.f32 0.125, %v203_v49  ;;  %752 = vmatpush3.bf16.msra.mxu0 %v751_v43  ;;  %711 = vmatprep.mubr.msk.f32.mxu0 %vm92_vm1, %v86_v11  ;;  %v493_v48 = vand.u32 127, %v391_v7 }
  0x5d   :  { %v221_v55 = vmul.f32 0.125, %v210_v50  ;;  %v222_v56 = vmul.f32 0.125, %v217_v51  ;;  %753 = vmatprep.subr.bf16.mxu0 %v912_v1  ;;  %v533_v7 = vsub.s32 3, %v1060_v9  ;;  %p884_p8 = pnand %p883_p7, %p877_p4 }
  0x5e   :  { %v232_v57 = vsel %vm231_vm2, %v220_v53, %v219_v52  ;;  %v1081_v50 = vsub.s32 %v493_v48, %v1060_v9 }
  0x5f   :  { %v234_v58 = vsel %vm233_vm3, %v221_v55, %v232_v57  ;;  %712 = vmatmul.mubr.msk.f32.gmra.mrb[2].mxu0 %vm92_vm1, %v1038_v12  ;;  %v1064_v12 = vsub.s32 0, %v1060_v9 }
  0x60   :  { %v236_v59 = vsel %vm235_vm4, %v222_v56, %v234_v58  ;;  %755 = vmatpush3.bf16.msra.mxu0 %v754_v54  ;;  %733 = vmatprep.mubr.msk.f32.mxu0 %vm913_vm0, %v914_v2  ;;  %v393_v2 = vsub.s32 %v390_v8, %v1060_v9 }
  0x61   :  { %723 = vmatmul.mubr.msk.f32.vlgmr.msra.gmra.mrb[0].mxu1 %vm92_vm1, %v236_v59 }
 0x12e   :  { %v710_v60 = vpop.f32.mrb[0].mxu0 }
 0x12f   :  { %v171_v61 = vpop.f32.mrb[1].mxu0 }
 0x132   :  { %v713_v62 = vpop.f32.mrb[2].mxu0 }
 0x133   :  { %v181_v63 = vpop.f32.mrb[3].mxu0 }
 0x134   :  { %v305_v0 = vpop.f32.mrb[0].mxu1 }
 0x135   :  { %v309_v1 = vmax.f32 %v305_v0, 0.0  ;;  %v724_v3 = vpop.f32.mrb[1].mxu1 }
 0x136   :  { %v529_v3 = vsub.s32 2, %v1060_v9 }
 0x137   :  { %734 = vmatmul.mubr.msk.f32.vlgmr.msra.gmra.mrb[4].mxu0 %vm92_vm1, %v309_v1  ;;  %v525_v1 = vsub.s32 1, %v1060_v9 }
 0x20a   :  { %v383_v10 = vpop.f32.mrb[4].mxu0 }
 0x20b   :  { %v394_v11 = vrot.slane %v383_v10, %v393_v2  ;;  %v735_v13 = vpop.f32.mrb[5].mxu0 }
 0x20d   :  { %v395_v14 = vcombine.high %v394_v11, %v394_v11  ;;  %v402_v15 = vrot.slane %v394_v11, %v393_v2 }
 0x20f   :  { %v409_v16 = vrot.slane %v395_v14, %v393_v2  ;;  %v410_v17 = vcombine.high %v402_v15, %v402_v15  ;;  %v415_v18 = vrot.slane %v402_v15, %v1064_v12 }
 0x211   :  { %v411_v20 = vcombine.high %v409_v16, %v409_v16  ;;  %v419_v21 = vrot.slane %v409_v16, %v1064_v12  ;;  %v423_v22 = vrot.slane %v410_v17, %v1064_v12  ;;  %v432_v23 = vadd.f32 %v415_v18, %v171_v61 }
 0x213   :  { %v427_v24 = vrot.slane %v411_v20, %v1064_v12  ;;  %v433_v25 = vadd.f32 %v710_v60, %v419_v21  ;;  %v434_v26 = vadd.f32 %v423_v22, %v181_v63  ;;  %v443_v27 = vadd.f32 %v679_v19, %v432_v23 }
 0x215   :  { %v435_v28 = vadd.f32 %v713_v62, %v427_v24  ;;  %v444_v29 = vadd.f32 %v679_v19, %v433_v25  ;;  %v445_v30 = vadd.f32 %v679_v19, %v434_v26  ;;  %770 = vtanh.f32 %v443_v27 }
 0x217   :  { %v446_v31 = vadd.f32 %v679_v19, %v435_v28  ;;  %772 = vtanh.f32 %v444_v29 }
 0x218   :  { %774 = vtanh.f32 %v445_v30 }
 0x219   :  { %776 = vtanh.f32 %v446_v31 }
 0x21f   :  { %v771_v33 = vpop.eup %770 }
 0x220   :  { %v458_v34 = vmul.f32 %v771_v33, %v680_v32 }
 0x221   :  { %v773_v35 = vpop.eup %772 }
 0x222   :  { %v775_v36 = vpop.eup %774  ;;  %v462_v37 = vsel %vm92_vm1, %v458_v34, 0.0  ;;  %v459_v38 = vmul.f32 %v773_v35, %v680_v32 }
 0x223   :  { %v777_v39 = vpop.eup %776  ;;  %463 = vadd.xlane.f32.xlu0 %v462_v37  ;;  %v460_v40 = vmul.f32 %v775_v36, %v680_v32 }
 0x224   :  { %v461_v42 = vmul.f32 %v777_v39, %v680_v32  ;;  %v465_v43 = vsel %vm92_vm1, %v459_v38, 0.0 }
 0x225   :  { %v468_v41 = vsel %vm92_vm1, %v460_v40, 0.0 }
 0x226   :  { %469 = vadd.xlane.f32.xlu1 %v468_v41  ;;  %v471_v44 = vsel %vm92_vm1, %v461_v42, 0.0 }
 0x227   :  { %466 = vadd.xlane.f32.xlu0 %v465_v43 }
 0x22a   :  { %472 = vadd.xlane.f32.xlu1 %v471_v44 }
 0x23d   :  { %481 = vperm.xlu0 %768, %v681_v45  }
 0x2b0   :  { %v464_v46 = vpop.xlane.xlu0 %463 }
 0x2b3   :  { %v470_v47 = vpop.xlane.xlu1 %469 }
 0x2b4   :  { %v467_v49 = vpop.xlane.xlu0 %466 }
 0x2b7   :  { %v473_v51 = vpop.xlane.xlu1 %472 }
 0x2bc   :  { %v482_v52 = vpop.permute.xlu0 %481 }
 0x2bd   :  { %v484_v53 = vadd.f32 %v482_v52, %v464_v46  ;;  %v485_v54 = vadd.f32 %v482_v52, %v467_v49  ;;  %v486_v55 = vadd.f32 %v482_v52, %v470_v47  ;;  %v487_v56 = vadd.f32 %v482_v52, %v473_v51 }
 0x2bf   :  { %v497_v57 = vrot.slane %v484_v53, %v1081_v50  ;;  %v501_v58 = vrot.slane %v485_v54, %v1081_v50  ;;  %v505_v59 = vrot.slane %v486_v55, %v1081_v50  ;;  %v509_v60 = vrot.slane %v487_v56, %v1081_v50 }
 0x2c1   :  { %v510_v61 = vsel %vm231_vm2, %v501_v58, %v497_v57 }
 0x2c2   :  { %v511_v62 = vsel %vm233_vm3, %v505_v59, %v510_v61 }
 0x2c3   :  { %v512_v63 = vsel %vm235_vm4, %v509_v60, %v511_v62 }
 0x2c4   :  { %v515_v0 = vsel %vm514_vm5, %v512_v63, -inf }
 0x2c5   :  { %516 = vmax.xlane.f32.xlu1 %v515_v0 }
 0x352   :  { %v517_v4 = vpop.xlane.xlu1 %516 }
 0x353   :  { %v522_v5 = vrot.slane %v517_v4, %v1064_v12  ;;  %v526_v6 = vrot.slane %v517_v4, %v525_v1  ;;  %v530_v8 = vrot.slane %v517_v4, %v529_v3  ;;  %v534_v13 = vrot.slane %v517_v4, %v533_v7 }
 0x355   :  { %v539_v2 = vsub.f32 %v484_v53, %v522_v5  ;;  %v540_v10 = vsub.f32 %v485_v54, %v526_v6  ;;  %v541_v14 = vsub.f32 %v486_v55, %v530_v8  ;;  %v542_v16 = vsub.f32 %v487_v56, %v534_v13 }
 0x357   :  { %v543_v11 = vmul.f32 1.442695, %v539_v2  ;;  %v545_v15 = vmul.f32 1.442695, %v540_v10  ;;  %v547_v17 = vmul.f32 1.442695, %v541_v14 }
 0x358   :  { %v549_v18 = vmul.f32 1.442695, %v542_v16 }
 0x359   :  { %778 = vpow2.f32 %v543_v11 }
 0x35a   :  { %780 = vpow2.f32 %v545_v15 }
 0x35b   :  { %782 = vpow2.f32 %v547_v17 }
 0x35c   :  { %784 = vpow2.f32 %v549_v18 }
 0x363   :  { %v779_v19 = vpop.eup %778 }
 0x364   :  { %556 = vperm.xlu1 %769, %v779_v19   ;;  %v781_v20 = vpop.eup %780 }
 0x365   :  { %v783_v21 = vpop.eup %782 }
 0x366   :  { %v785_v9 = vpop.eup %784 }
 0x368   :  { %559 = vperm.xlu1 %769, %v781_v20  }
 0x36c   :  { %562 = vperm.xlu1 %769, %v783_v21  }
 0x370   :  { %565 = vperm.xlu1 %769, %v785_v9  }
 0x3e3   :  { %v557_v22 = vpop.permute.xlu1 %556 }
 0x3e4   :  { %v570_v27 = vrot.slane %v557_v22, %v1081_v50 }
 0x3e7   :  { %v560_v23 = vpop.permute.xlu1 %559 }
 0x3e8   :  { %v574_v25 = vrot.slane %v560_v23, %v1081_v50 }
 0x3ea   :  { %v583_v29 = vsel %vm231_vm2, %v574_v25, %v570_v27 }
 0x3eb   :  { %v563_v24 = vpop.permute.xlu1 %562 }
 0x3ec   :  { %v578_v26 = vrot.slane %v563_v24, %v1081_v50 }
 0x3ee   :  { %v584_v31 = vsel %vm233_vm3, %v578_v26, %v583_v29 }
 0x3ef   :  { %v566_v28 = vpop.permute.xlu1 %565 }
 0x3f0   :  { %v582_v30 = vrot.slane %v566_v28, %v1081_v50 }
 0x3f2   :  { %v585_v32 = vsel %vm235_vm4, %v582_v30, %v584_v31 }
 0x3f3   :  { %v587_v33 = vsel %vm514_vm5, %v585_v32, 0.0 }
 0x3f4   :  { %588 = vadd.xlane.f32.xlu1 %v587_v33 }
 0x481   :  { %v589_v34 = vpop.xlane.xlu1 %588 }
 0x482   :  { %786 = vrcp.f32 %v589_v34 }
 0x48c   :  { %v787_v35 = vpop.eup %786 }
 0x48d   :  { %v591_v36 = vmul.f32 %v787_v35, %v589_v34 }
 0x48f   :  { %v592_v37 = vsub.f32 2.0, %v591_v36 }
 0x491   :  { %v593_v38 = vmul.f32 %v787_v35, %v592_v37 }
 0x493   :  { %v598_v39 = vrot.slane %v593_v38, %v1064_v12  ;;  %v602_v41 = vrot.slane %v593_v38, %v525_v1  ;;  %v606_v43 = vrot.slane %v593_v38, %v529_v3  ;;  %v610_v45 = vrot.slane %v593_v38, %v533_v7 }
 0x495   :  { %v615_v40 = vmul.f32 %v779_v19, %v598_v39  ;;  %v616_v42 = vmul.f32 %v781_v20, %v602_v41  ;;  %v617_v44 = vmul.f32 %v783_v21, %v606_v43  ;;  %v618_v46 = vmul.f32 %v785_v9, %v610_v45 }
 0x497   :  { %624 = vperm.xlu0 %768, %v615_v40  }
 0x49b   :  { %627 = vperm.xlu0 %768, %v616_v42  }
 0x49f   :  { %630 = vperm.xlu0 %768, %v617_v44  }
 0x4a3   :  { %633 = vperm.xlu0 %768, %v618_v46  }
 0x516   :  { %v625_v47 = vpop.permute.xlu0 %624 }
 0x517   :  { %v638_v12 = vrot.slane %v625_v47, %v1081_v50 }
 0x51a   :  { %v628_v48 = vpop.permute.xlu0 %627 }
 0x51b   :  { %v642_v51 = vrot.slane %v628_v48, %v1081_v50 }
 0x51d   :  { %v651_v54 = vsel %vm231_vm2, %v642_v51, %v638_v12 }
 0x51e   :  { %v631_v49 = vpop.permute.xlu0 %630 }
 0x51f   :  { %v646_v52 = vrot.slane %v631_v49, %v1081_v50 }
 0x521   :  { %v652_v56 = vsel %vm233_vm3, %v646_v52, %v651_v54 }
 0x522   :  { %v634_v53 = vpop.permute.xlu0 %633 }
 0x523   :  { %v650_v55 = vrot.slane %v634_v53, %v1081_v50 }
 0x525   :  { %v653_v57 = vsel %vm235_vm4, %v650_v55, %v652_v56 }
 0x526   :  { %655 = vst.msk [vmem:[#allocation11] sm:$0xf] %vm514_vm5, %v653_v57 }
 0x527   :  { %887 = shalt.err (!%p884_p8)
}
 0x528   :  { %s888_s8 = scalar_lea.hbm %s1131_s7, 64 }
 0x529   :  { %p889_p9 = scmp.ne.s32.totalorder %s1131_s7, %s888_s8  ;;  %p892_p10 = scmp.lt.u32.totalorder %s888_s8, %s1131_s7 }
 0x52b   :  { %p894_p11 = pnand %p892_p10, %p889_p9 }
 0x52d   :  { %897 = shalt.err (!%p894_p11)
}
 0x52e   :  { %665 = dma.vmem_to_hbm [thread:$0]  %s663_s26, 64, %s1131_s7, [#allocation5]  }
 0x52f   :  { %904 = dma.done.wait [#allocation5], 64  }
 0x530   :  { %905 = vsyncadd [#allocation5], 4294967232 }
 0x531   :  { %669 = vsyncpa [#allocation4], 1 }
 0x532   :  { %670 = vsyncpa [#allocation7], 1 }
 0x533   :  { %671 = vsyncpa [#allocation10], 1 }
 0x534   :  { %672 = vsyncpa [#allocation5], 1 }

</bundles_post_ra>
